<compile_context>
chip_gen: v6e
topology: v6e:2x2x1
jax: 0.10.0
libtpu: 0.0.40
codegen_flags: <defaults>
</compile_context>

<pallas_src>
import functools

import jax
import jax.numpy as jnp
import numpy as np
from jax.experimental import pallas as pl
from jax.experimental.pallas import tpu as pltpu

_BIG = 1e30  # finite "+inf" sentinel for the min-over-negatives reduction


def _round_up(x: int, m: int) -> int:
    return ((x + m - 1) // m) * m


def _hard_soft_margin_kernel(emb_a_ref, emb_c_ref, sq_a_ref, sq_c_ref,
                             lab_a_ref, lab_c_ref, out_ref,
                             hp2_ref, rmax2_ref, minneg2_ref, *, B, tm, tn):
    i = pl.program_id(0)  # anchor-row tile
    j = pl.program_id(1)  # candidate-column tile (reduction axis)

    @pl.when(j == 0)
    def _init():
        hp2_ref[...] = jnp.zeros_like(hp2_ref)          # max(mask*d2) >= 0
        rmax2_ref[...] = jnp.zeros_like(rmax2_ref)      # d2 >= 0 -> 0 is identity
        minneg2_ref[...] = jnp.full_like(minneg2_ref, _BIG)

    a = emb_a_ref[...]                                  # (tm, D), caller dtype
    c = emb_c_ref[...]                                  # (tn, D), caller dtype

    # Gram block: contract lane dim of both operands (no transpose), f32 accum.
    dot = jax.lax.dot_general(a, c, (((1,), (1,)), ((), ())),
                              preferred_element_type=jnp.float32)  # (tm, tn)

    # Squared distance ||a||^2 - 2 a.c + ||c||^2 (norms streamed from wrapper).
    # All reductions are done in squared space; sqrt happens in the epilogue.
    d2 = jnp.maximum(sq_a_ref[...] - 2.0 * dot + sq_c_ref[...], 0.0)  # (tm, tn)

    same = lab_a_ref[...] == lab_c_ref[...]             # (tm, tn) bool

    row_ids = i * tm + jax.lax.broadcasted_iota(jnp.int32, (tm, tn), 0)
    col_ids = j * tn + jax.lax.broadcasted_iota(jnp.int32, (tm, tn), 1)
    off_diag = row_ids != col_ids
    col_valid = col_ids < B                             # mask padded candidates

    # hardest positive: max over same-label, off-diagonal pairs
    hp2_ref[...] = jnp.maximum(
        hp2_ref[...],
        jnp.max(jnp.where(same & off_diag & col_valid, d2, 0.0),
                axis=1, keepdims=True))
    # row max over all valid pairs (fallback for rows without negatives)
    rmax2_ref[...] = jnp.maximum(
        rmax2_ref[...],
        jnp.max(jnp.where(col_valid, d2, 0.0), axis=1, keepdims=True))
    # min over different-label pairs
    minneg2_ref[...] = jnp.minimum(
        minneg2_ref[...],
        jnp.min(jnp.where((~same) & col_valid, d2, _BIG),
                axis=1, keepdims=True))

    @pl.when(j == pl.num_programs(1) - 1)
    def _finalize():
        # sqrt is monotone -> max/min of sqrt(d2) == sqrt(max/min of d2).
        hp = jnp.sqrt(hp2_ref[...])
        hn = jnp.sqrt(jnp.minimum(minneg2_ref[...], rmax2_ref[...]))
        x = hp - hn
        # stable softplus == log1p(exp(x)) everywhere the naive form is finite
        tl = jnp.maximum(x, 0.0) + jnp.log1p(jnp.exp(-jnp.abs(x)))
        row_valid = (i * tm
                     + jax.lax.broadcasted_iota(jnp.int32, (tm, 1), 0)) < B
        out_ref[...] = jnp.where(row_valid, tl, 0.0)    # padded rows -> 0


def hard_soft_margin_triplet_loss(embeddings: jax.Array,
                                  labels: jax.Array,
                                  *,
                                  tile: int = 256,
                                  vmem_limit_bytes: int = 48 * 1024 * 1024,
                                  ) -> jax.Array:
    """embeddings: (B, D) float32/bfloat16, labels: (B,) int -> scalar f32 loss."""
    assert tile % 128 == 0, "tile must be a multiple of 128 (lane constraint)"
    B, D = embeddings.shape
    lab = labels.astype(jnp.int32)

    # Tile size: multiple of 8; for tiny B a single full-array tile is used.
    T = min(tile, _round_up(B, 8))
    B_pad = _round_up(B, T)
    n_tiles = B_pad // T

    emb = embeddings  # keep caller dtype (bf16 OK on v6e/v7x; accum is f32)
    if B_pad != B:
        emb = jnp.pad(emb, ((0, B_pad - B), (0, 0)))
        lab = jnp.pad(lab, (0, B_pad - B), constant_values=-1)

    # Squared norms computed once (fused by XLA), streamed to the kernel.
    sq = jnp.sum(jnp.square(emb.astype(jnp.float32)), axis=1)   # (B_pad,)
    sq_row = sq.reshape(B_pad, 1)
    sq_col = sq.reshape(1, B_pad)
    lab_row = lab.reshape(B_pad, 1)
    lab_col = lab.reshape(1, B_pad)

    kernel = functools.partial(_hard_soft_margin_kernel, B=B, tm=T, tn=T)

    per_row_loss = pl.pallas_call(
        kernel,
        out_shape=jax.ShapeDtypeStruct((B_pad, 1), jnp.float32),
        grid_spec=pltpu.PrefetchScalarGridSpec(
            num_scalar_prefetch=0,
            grid=(n_tiles, n_tiles),
            in_specs=[
                pl.BlockSpec((T, D), lambda i, j: (i, 0)),   # anchor emb (resident over j)
                pl.BlockSpec((T, D), lambda i, j: (j, 0)),   # candidate emb
                pl.BlockSpec((T, 1), lambda i, j: (i, 0)),   # anchor ||.||^2
                pl.BlockSpec((1, T), lambda i, j: (0, j)),   # candidate ||.||^2
                pl.BlockSpec((T, 1), lambda i, j: (i, 0)),   # anchor labels
                pl.BlockSpec((1, T), lambda i, j: (0, j)),   # candidate labels
            ],
            out_specs=pl.BlockSpec((T, 1), lambda i, j: (i, 0)),
            scratch_shapes=[
                pltpu.VMEM((T, 1), jnp.float32),   # hardest positive d2 (running max)
                pltpu.VMEM((T, 1), jnp.float32),   # row max d2 (running max)
                pltpu.VMEM((T, 1), jnp.float32),   # min d2 over negatives (running min)
            ],
        ),
        compiler_params=pltpu.CompilerParams(
            dimension_semantics=("parallel", "arbitrary"),
            vmem_limit_bytes=vmem_limit_bytes,
        ),
    )(emb, emb, sq_row, sq_col, lab_row, lab_col)

    # Padded rows were zeroed in-kernel; mean over the B real anchors.
    return jnp.sum(per_row_loss) / B


def _reference(embeddings, labels):
    """Pure-JAX mirror of the PyTorch HardSoftMarginTripletLoss forward."""
    emb = embeddings.astype(jnp.float32)
    dot = emb @ emb.T
    sq = jnp.diag(dot)
    dist = sq[None, :] - 2.0 * dot + sq[:, None]
    dist = jnp.maximum(dist, 0.0)
    zm = (dist == 0.0).astype(jnp.float32)
    dist = (1.0 - zm) * jnp.sqrt(dist + zm * 1e-16)
    eye = jnp.eye(labels.shape[0], dtype=bool)
    leq = labels[None, :] == labels[:, None]
    mask_ap = jnp.logical_and(leq, ~eye).astype(jnp.float32)
    hp = jnp.max(mask_ap * dist, axis=1, keepdims=True)
    mask_an = (~leq).astype(jnp.float32)
    mx = jnp.max(dist, axis=1, keepdims=True)
    hn = jnp.min(dist + mx * (1.0 - mask_an), axis=1, keepdims=True)
    return jnp.mean(jnp.log1p(jnp.exp(hp - hn)))


if __name__ == "__main__":
    key = jax.random.PRNGKey(0)

    # Case 1: tiny batch (single full-array tile path).
    B, D = 8, 32
    embeddings = jax.random.normal(key, (B, D), dtype=jnp.float32)
    labels = jnp.array([0, 0, 1, 1, 2, 2, 3, 3], dtype=jnp.int32)
    loss = hard_soft_margin_triplet_loss(embeddings, labels)
    jax.block_until_ready(loss)
    ref = _reference(embeddings, labels)
    assert np.allclose(np.asarray(loss), np.asarray(ref), rtol=1e-5, atol=1e-5), (loss, ref)

    # Case 2: multi-tile grid + row/column padding path.
    k1, k2 = jax.random.split(key)
    B2, D2 = 200, 32
    emb2 = jax.random.normal(k1, (B2, D2), dtype=jnp.float32)
    labels2 = jax.random.randint(k2, (B2,), 0, 10, dtype=jnp.int32)
    loss2 = hard_soft_margin_triplet_loss(emb2, labels2, tile=128)
    jax.block_until_ready(loss2)
    ref2 = _reference(emb2, labels2)
    assert np.allclose(np.asarray(loss2), np.asarray(ref2), rtol=1e-4, atol=1e-5), (loss2, ref2)

    print("KERNEL_OK")
</pallas_src>

<mosaic_0001>
module attributes {stable_mosaic.version = 11 : i64} {
  func.func @_hard_soft_margin_kernel(%arg0: i32, %arg1: i32, %arg2: memref<8x32xf32, #tpu.memory_space<vmem>>, %arg3: memref<8x32xf32, #tpu.memory_space<vmem>>, %arg4: memref<8x1xf32, #tpu.memory_space<vmem>>, %arg5: memref<1x8xf32, #tpu.memory_space<vmem>>, %arg6: memref<8x1xi32, #tpu.memory_space<vmem>>, %arg7: memref<1x8xi32, #tpu.memory_space<vmem>>, %arg8: memref<8x1xf32, #tpu.memory_space<vmem>>, %arg9: memref<8x1xf32, #tpu.memory_space<vmem>>, %arg10: memref<8x1xf32, #tpu.memory_space<vmem>>, %arg11: memref<8x1xf32, #tpu.memory_space<vmem>>) attributes {dimension_semantics = [#tpu.dimension_semantics<parallel>, #tpu.dimension_semantics<arbitrary>], iteration_bounds = array<i64: 1, 1>, scalar_prefetch = 0 : i64, scratch_operands = 3 : i64, tpu.core_type = #tpu.core_type<tc>, window_params = [{transform_indices = @transform_0, window_bounds = array<i64: 8, 32>}, {transform_indices = @transform_1, window_bounds = array<i64: 8, 32>}, {transform_indices = @transform_2, window_bounds = array<i64: 8, 1>}, {transform_indices = @transform_3, window_bounds = array<i64: 1, 8>}, {transform_indices = @transform_4, window_bounds = array<i64: 8, 1>}, {transform_indices = @transform_5, window_bounds = array<i64: 1, 8>}, {transform_indices = @transform_6, window_bounds = array<i64: 8, 1>}]} {
    %c0_i32 = arith.constant 0 : i32
    %0 = arith.cmpi eq, %arg1, %c0_i32 : i32
    %1 = arith.extui %0 : i1 to i32
    %c0_i32_0 = arith.constant 0 : i32
    %2 = arith.cmpi ne, %1, %c0_i32_0 : i32
    scf.if %2 {
      %cst_37 = arith.constant 0.000000e+00 : f32
      %60 = vector.broadcast %cst_37 : f32 to vector<8x1xf32>
      %c0_38 = arith.constant 0 : index
      %c0_39 = arith.constant 0 : index
      %61 = vector.load %arg9[%c0_38, %c0_39] : memref<8x1xf32, #tpu.memory_space<vmem>>, vector<8x1xf32>
      tpu.vector_store %arg9[%c0_38, %c0_39], %60 {strides = array<i32>} : memref<8x1xf32, #tpu.memory_space<vmem>>, vector<8x1xf32>,
      %cst_40 = arith.constant 0.000000e+00 : f32
      %62 = vector.broadcast %cst_40 : f32 to vector<8x1xf32>
      %c0_41 = arith.constant 0 : index
      %c0_42 = arith.constant 0 : index
      %63 = vector.load %arg10[%c0_41, %c0_42] : memref<8x1xf32, #tpu.memory_space<vmem>>, vector<8x1xf32>
      tpu.vector_store %arg10[%c0_41, %c0_42], %62 {strides = array<i32>} : memref<8x1xf32, #tpu.memory_space<vmem>>, vector<8x1xf32>,
      %cst_43 = arith.constant 1.000000e+30 : f32
      %64 = vector.broadcast %cst_43 : f32 to vector<8x1xf32>
      %c0_44 = arith.constant 0 : index
      %c0_45 = arith.constant 0 : index
      %65 = vector.load %arg11[%c0_44, %c0_45] : memref<8x1xf32, #tpu.memory_space<vmem>>, vector<8x1xf32>
      tpu.vector_store %arg11[%c0_44, %c0_45], %64 {strides = array<i32>} : memref<8x1xf32, #tpu.memory_space<vmem>>, vector<8x1xf32>,
    } else {
    }
    %c0 = arith.constant 0 : index
    %c0_1 = arith.constant 0 : index
    %3 = vector.load %arg2[%c0, %c0_1] : memref<8x32xf32, #tpu.memory_space<vmem>>, vector<8x32xf32>
    %c0_2 = arith.constant 0 : index
    %c0_3 = arith.constant 0 : index
    %4 = vector.load %arg3[%c0_2, %c0_3] : memref<8x32xf32, #tpu.memory_space<vmem>>, vector<8x32xf32>
    %cst = arith.constant dense<0.000000e+00> : vector<8x8xf32>
    %5 = tpu.matmul %3, %4, %cst {dimension_numbers = #tpu.dot_dimension_numbers<[1], [1], [0], [0], [0, 0, 1, 0], [], []>} : vector<8x32xf32>, vector<8x32xf32>, vector<8x8xf32> -> vector<8x8xf32>
    %c0_4 = arith.constant 0 : index
    %c0_5 = arith.constant 0 : index
    %6 = vector.load %arg4[%c0_4, %c0_5] : memref<8x1xf32, #tpu.memory_space<vmem>>, vector<8x1xf32>
    %cst_6 = arith.constant 2.000000e+00 : f32
    %7 = vector.broadcast %cst_6 : f32 to vector<8x8xf32>
    %8 = arith.mulf %7, %5 : vector<8x8xf32>
    %9 = vector.broadcast %6 : vector<8x1xf32> to vector<8x8xf32>
    %10 = arith.subf %9, %8 : vector<8x8xf32>
    %c0_7 = arith.constant 0 : index
    %c0_8 = arith.constant 0 : index
    %11 = vector.load %arg5[%c0_7, %c0_8] : memref<1x8xf32, #tpu.memory_space<vmem>>, vector<1x8xf32>
    %12 = vector.broadcast %11 : vector<1x8xf32> to vector<8x8xf32>
    %13 = arith.addf %10, %12 : vector<8x8xf32>
    %cst_9 = arith.constant 0.000000e+00 : f32
    %14 = vector.broadcast %cst_9 : f32 to vector<8x8xf32>
    %15 = arith.maximumf %13, %14 : vector<8x8xf32>
    %c0_10 = arith.constant 0 : index
    %c0_11 = arith.constant 0 : index
    %16 = vector.load %arg6[%c0_10, %c0_11] : memref<8x1xi32, #tpu.memory_space<vmem>>, vector<8x1xi32>
    %c0_12 = arith.constant 0 : index
    %c0_13 = arith.constant 0 : index
    %17 = vector.load %arg7[%c0_12, %c0_13] : memref<1x8xi32, #tpu.memory_space<vmem>>, vector<1x8xi32>
    %18 = vector.broadcast %16 : vector<8x1xi32> to vector<8x8xi32>
    %19 = vector.broadcast %17 : vector<1x8xi32> to vector<8x8xi32>
    %20 = arith.cmpi eq, %18, %19 : vector<8x8xi32>
    %c8_i32 = arith.constant 8 : i32
    %21 = arith.muli %arg0, %c8_i32 : i32
    %22 = tpu.iota {dimensions = array<i32: 0>} : vector<8x8xi32>
    %23 = vector.broadcast %21 : i32 to vector<8x8xi32>
    %24 = arith.addi %23, %22 : vector<8x8xi32>
    %c8_i32_14 = arith.constant 8 : i32
    %25 = arith.muli %arg1, %c8_i32_14 : i32
    %26 = tpu.iota {dimensions = array<i32: 1>} : vector<8x8xi32>
    %27 = vector.broadcast %25 : i32 to vector<8x8xi32>
    %28 = arith.addi %27, %26 : vector<8x8xi32>
    %29 = arith.cmpi ne, %24, %28 : vector<8x8xi32>
    %c8_i32_15 = arith.constant 8 : i32
    %30 = vector.broadcast %c8_i32_15 : i32 to vector<8x8xi32>
    %31 = arith.cmpi slt, %28, %30 : vector<8x8xi32>
    %c0_16 = arith.constant 0 : index
    %c0_17 = arith.constant 0 : index
    %32 = vector.load %arg9[%c0_16, %c0_17] : memref<8x1xf32, #tpu.memory_space<vmem>>, vector<8x1xf32>
    %33 = arith.andi %20, %29 : vector<8x8xi1>
    %34 = arith.andi %33, %31 : vector<8x8xi1>
    %cst_18 = arith.constant 0.000000e+00 : f32
    %35 = vector.broadcast %cst_18 : f32 to vector<8x8xf32>
    %36 = arith.select %34, %15, %35 : vector<8x8xi1>, vector<8x8xf32>
    %cst_19 = arith.constant dense<0xFF800000> : vector<8xf32>
    %37 = vector.multi_reduction <maximumf>, %36, %cst_19 [1] : vector<8x8xf32> to vector<8xf32>
    %38 = vector.shape_cast %37 : vector<8xf32> to vector<8x1xf32>
    %39 = arith.maximumf %32, %38 : vector<8x1xf32>
    %c0_20 = arith.constant 0 : index
    %c0_21 = arith.constant 0 : index
    %40 = vector.load %arg9[%c0_20, %c0_21] : memref<8x1xf32, #tpu.memory_space<vmem>>, vector<8x1xf32>
    tpu.vector_store %arg9[%c0_20, %c0_21], %39 {strides = array<i32>} : memref<8x1xf32, #tpu.memory_space<vmem>>, vector<8x1xf32>,
    %c0_22 = arith.constant 0 : index
    %c0_23 = arith.constant 0 : index
    %41 = vector.load %arg10[%c0_22, %c0_23] : memref<8x1xf32, #tpu.memory_space<vmem>>, vector<8x1xf32>
    %cst_24 = arith.constant 0.000000e+00 : f32
    %42 = vector.broadcast %cst_24 : f32 to vector<8x8xf32>
    %43 = arith.select %31, %15, %42 : vector<8x8xi1>, vector<8x8xf32>
    %cst_25 = arith.constant dense<0xFF800000> : vector<8xf32>
    %44 = vector.multi_reduction <maximumf>, %43, %cst_25 [1] : vector<8x8xf32> to vector<8xf32>
    %45 = vector.shape_cast %44 : vector<8xf32> to vector<8x1xf32>
    %46 = arith.maximumf %41, %45 : vector<8x1xf32>
    %c0_26 = arith.constant 0 : index
    %c0_27 = arith.constant 0 : index
    %47 = vector.load %arg10[%c0_26, %c0_27] : memref<8x1xf32, #tpu.memory_space<vmem>>, vector<8x1xf32>
    tpu.vector_store %arg10[%c0_26, %c0_27], %46 {strides = array<i32>} : memref<8x1xf32, #tpu.memory_space<vmem>>, vector<8x1xf32>,
    %c0_28 = arith.constant 0 : index
    %c0_29 = arith.constant 0 : index
    %48 = vector.load %arg11[%c0_28, %c0_29] : memref<8x1xf32, #tpu.memory_space<vmem>>, vector<8x1xf32>
    %cst_30 = arith.constant dense<true> : vector<8x8xi1>
    %49 = arith.xori %20, %cst_30 : vector<8x8xi1>
    %50 = arith.andi %49, %31 : vector<8x8xi1>
    %cst_31 = arith.constant 1.000000e+30 : f32
    %51 = vector.broadcast %cst_31 : f32 to vector<8x8xf32>
    %52 = arith.select %50, %15, %51 : vector<8x8xi1>, vector<8x8xf32>
    %cst_32 = arith.constant dense<0x7F800000> : vector<8xf32>
    %53 = vector.multi_reduction <minimumf>, %52, %cst_32 [1] : vector<8x8xf32> to vector<8xf32>
    %54 = vector.shape_cast %53 : vector<8xf32> to vector<8x1xf32>
    %55 = arith.minimumf %48, %54 : vector<8x1xf32>
    %c0_33 = arith.constant 0 : index
    %c0_34 = arith.constant 0 : index
    %56 = vector.load %arg11[%c0_33, %c0_34] : memref<8x1xf32, #tpu.memory_space<vmem>>, vector<8x1xf32>
    tpu.vector_store %arg11[%c0_33, %c0_34], %55 {strides = array<i32>} : memref<8x1xf32, #tpu.memory_space<vmem>>, vector<8x1xf32>,
    %c0_i32_35 = arith.constant 0 : i32
    %57 = arith.cmpi eq, %arg1, %c0_i32_35 : i32
    %58 = arith.extui %57 : i1 to i32
    %c0_i32_36 = arith.constant 0 : i32
    %59 = arith.cmpi ne, %58, %c0_i32_36 : i32
    scf.if %59 {
      %c0_37 = arith.constant 0 : index
      %c0_38 = arith.constant 0 : index
      %60 = vector.load %arg9[%c0_37, %c0_38] : memref<8x1xf32, #tpu.memory_space<vmem>>, vector<8x1xf32>
      %61 = math.sqrt %60 : vector<8x1xf32>
      %c0_39 = arith.constant 0 : index
      %c0_40 = arith.constant 0 : index
      %62 = vector.load %arg11[%c0_39, %c0_40] : memref<8x1xf32, #tpu.memory_space<vmem>>, vector<8x1xf32>
      %c0_41 = arith.constant 0 : index
      %c0_42 = arith.constant 0 : index
      %63 = vector.load %arg10[%c0_41, %c0_42] : memref<8x1xf32, #tpu.memory_space<vmem>>, vector<8x1xf32>
      %64 = arith.minimumf %62, %63 : vector<8x1xf32>
      %65 = math.sqrt %64 : vector<8x1xf32>
      %66 = arith.subf %61, %65 : vector<8x1xf32>
      %cst_43 = arith.constant 0.000000e+00 : f32
      %67 = vector.broadcast %cst_43 : f32 to vector<8x1xf32>
      %68 = arith.maximumf %66, %67 : vector<8x1xf32>
      %69 = math.absf %66 : vector<8x1xf32>
      %cst_44 = arith.constant 0.000000e+00 : f32
      %70 = vector.broadcast %cst_44 : f32 to vector<8x1xf32>
      %71 = arith.subf %70, %69 : vector<8x1xf32>
      %72 = math.exp %71 : vector<8x1xf32>
      %73 = math.log1p %72 : vector<8x1xf32>
      %74 = arith.addf %68, %73 : vector<8x1xf32>
      %c8_i32_45 = arith.constant 8 : i32
      %75 = arith.muli %arg0, %c8_i32_45 : i32
      %76 = tpu.iota {dimensions = array<i32: 0>} : vector<8x1xi32>
      %77 = vector.broadcast %75 : i32 to vector<8x1xi32>
      %78 = arith.addi %77, %76 : vector<8x1xi32>
      %c8_i32_46 = arith.constant 8 : i32
      %79 = vector.broadcast %c8_i32_46 : i32 to vector<8x1xi32>
      %80 = arith.cmpi slt, %78, %79 : vector<8x1xi32>
      %cst_47 = arith.constant 0.000000e+00 : f32
      %81 = vector.broadcast %cst_47 : f32 to vector<8x1xf32>
      %82 = arith.select %80, %74, %81 : vector<8x1xi1>, vector<8x1xf32>
      %c0_48 = arith.constant 0 : index
      %c0_49 = arith.constant 0 : index
      %83 = vector.load %arg8[%c0_48, %c0_49] : memref<8x1xf32, #tpu.memory_space<vmem>>, vector<8x1xf32>
      tpu.vector_store %arg8[%c0_48, %c0_49], %82 {strides = array<i32>} : memref<8x1xf32, #tpu.memory_space<vmem>>, vector<8x1xf32>,
    } else {
    }
    return
  }
  func.func @transform_0(%arg0: i32, %arg1: i32) -> (i32, i32) {
    %c0_i32 = arith.constant 0 : i32
    %c0_i32_0 = arith.constant 0 : i32
    return %arg0, %c0_i32 : i32, i32
  }
  func.func @transform_1(%arg0: i32, %arg1: i32) -> (i32, i32) {
    %c0_i32 = arith.constant 0 : i32
    %c0_i32_0 = arith.constant 0 : i32
    return %arg1, %c0_i32 : i32, i32
  }
  func.func @transform_2(%arg0: i32, %arg1: i32) -> (i32, i32) {
    %c0_i32 = arith.constant 0 : i32
    %c0_i32_0 = arith.constant 0 : i32
    return %arg0, %c0_i32 : i32, i32
  }
  func.func @transform_3(%arg0: i32, %arg1: i32) -> (i32, i32) {
    %c0_i32 = arith.constant 0 : i32
    %c0_i32_0 = arith.constant 0 : i32
    return %c0_i32, %arg1 : i32, i32
  }
  func.func @transform_4(%arg0: i32, %arg1: i32) -> (i32, i32) {
    %c0_i32 = arith.constant 0 : i32
    %c0_i32_0 = arith.constant 0 : i32
    return %arg0, %c0_i32 : i32, i32
  }
  func.func @transform_5(%arg0: i32, %arg1: i32) -> (i32, i32) {
    %c0_i32 = arith.constant 0 : i32
    %c0_i32_0 = arith.constant 0 : i32
    return %c0_i32, %arg1 : i32, i32
  }
  func.func @transform_6(%arg0: i32, %arg1: i32) -> (i32, i32) {
    %c0_i32 = arith.constant 0 : i32
    %c0_i32_0 = arith.constant 0 : i32
    return %arg0, %c0_i32 : i32, i32
  }
}

</mosaic_0001>

<bundles_post_ra>
// kernel: tpu_custom_call.1
= control target key start
LH: loop header
LB: loop body
LE: loop exit
PB: predicated region body
PF: predicated region fallthrough
CT: control target
= control target key end

     0   :  { %vm27_vm0 = vcmask 7168   ;;  %vm33_vm1 = vcmask 261120   ;;  %v245_v0 = vmov 0.0   ;;  %vm246_vm2 = vmmov 0   ;;  %s315_s1 = inlined_call_operand.vmem [shape: f32[8,32], index: 1, kind: input, shape index: {}]   ;;  %s316_s0 = inlined_call_operand.vmem [shape: f32[8,32], index: 0, kind: input, shape index: {}]   ;;  %s317_s2 = inlined_call_operand.vmem [shape: f32[8,1], index: 2, kind: input, shape index: {}]   ;;  %s318_s4 = inlined_call_operand.vmem [shape: s32[8,1], index: 4, kind: input, shape index: {}]   ;;  %s319_s5 = inlined_call_operand.vmem [shape: s32[1,8], index: 5, kind: input, shape index: {}]   ;;  %s320_s3 = inlined_call_operand.vmem [shape: f32[1,8], index: 3, kind: input, shape index: {}]   ;;  %s321_s6 = inlined_call_operand.vmem [shape: f32[8,1], index: 6, kind: output, shape index: {}]  }
   0x1   :  { %28 = vst.msk [vmem:[#allocation2] sm:$0xff] %vm27_vm0, %v245_v0  ;;  %29 = vst.msk [vmem:[#allocation3] sm:$0xff] %vm27_vm0, %v245_v0  ;;  %226 = vmatprep.subr.mxu0 %v245_v0  ;;  %v32_v1 = vld [vmem:[%s315_s1] sm:$0xff]  ;;  %228 = vmatprep.mubr.msk.f32.mxu0 %vm246_vm2, %v245_v0  ;;  %v247_v4 = vmov 0   ;;  %v138_v7 = vlaneseq  ;;  %vm248_vm7 = vmmov 1   ;;  %vm153_vm9 = vcmask 64512  }
   0x2   :  { %v110_v2 = vld [vmem:[%s317_s2] sm:$0xff]  ;;  %227 = vmatpush3.xpose.msk.msra.mxu0 %vm33_vm1, %v32_v1  ;;  %236 = vset.pattern.permute.xlu0 %v247_v4  ;;  %v249_v25 = vmov 1e+30  }
   0x3   :  { %v31_v3 = vld [vmem:[%s316_s0] sm:$0xff]  ;;  %114 = vperm.xlu0 %236, %v110_v2   ;;  %v139_v8 = vshrl.u32 %v138_v7, 7  ;;  %v144_v9 = vand.u32 127, %v138_v7  ;;  %30 = vst.msk [vmem:[#allocation4] sm:$0xff] %vm27_vm0, %v249_v25 }
   0x4   :  { %v127_v5 = vld [vmem:[%s318_s4] sm:$0xff] }
   0x5   :  { %229 = vmatmul.mubr.msk.f32.vlgmr.msra.gmra.mxu0 %vm33_vm1, %v31_v3  ;;  %v223_v10 = vld [vmem:[%s319_s5] ss:$0 sm:$0xff]  ;;  %vm147_vm3 = vcmp.ne.s32.totalorder %v139_v8, %v144_v9  ;;  %vm148_vm6 = vcmp.lt.s32.totalorder %v144_v9, 8 }
   0x6   :  { %v222_v14 = vld [vmem:[%s320_s3] ss:$0 sm:$0xff] }
   0x7   :  { %130 = vperm.xlu0 %236, %v127_v5  }
   0x8   :  { %v160_v26 = vld [vmem:[#allocation3] sm:$0xff]  ;;  %v149_v27 = vld [vmem:[#allocation2] sm:$0xff] }
   0xa   :  { %v167_v32 = vld [vmem:[#allocation4] sm:$0xff] }
  0x7e   :  { %v115_v6 = vpop.permute.xlu0 %114 }
  0x82   :  { %v131_v11 = vpop.permute.xlu0 %130 }
  0x83   :  { %vm136_vm4 = vcmp.eq.s32.totalorder %v131_v11, %v223_v10 }
  0x84   :  { %vm150_vm5 = vmand %vm136_vm4, %vm147_vm3 }
  0x85   :  { %vm168_vm8 = vmxor %vm136_vm4, %vm248_vm7 }
  0x86   :  { %vm151_vm10 = vmand %vm150_vm5, %vm148_vm6 }
  0x87   :  { %vm169_vm11 = vmand %vm168_vm8, %vm148_vm6 }
  0xc5   :  { %v106_v12 = vpop.f32.mrf.mxu0 }
  0xc6   :  { %v111_v13 = vmul.f32 2.0, %v106_v12 }
  0xc7   :  { %v230_v15 = vpop.f32.mrf.mxu0 }
  0xc8   :  { %v117_v16 = vsub.f32 %v115_v6, %v111_v13 }
  0xca   :  { %v125_v17 = vadd.f32 %v222_v14, %v117_v16 }
  0xcc   :  { %v126_v18 = vmax.f32 %v125_v17, 0.0 }
  0xce   :  { %v161_v19 = vsel %vm148_vm6, %v126_v18, 0.0  ;;  %v152_v20 = vsel %vm151_vm10, %v126_v18, 0.0  ;;  %v170_v23 = vsel %vm169_vm11, %v126_v18, 1e+30 }
  0xcf   :  { %v162_v21 = vsel %vm153_vm9, %v161_v19, -inf  ;;  %v154_v22 = vsel %vm153_vm9, %v152_v20, -inf  ;;  %v171_v24 = vsel %vm153_vm9, %v170_v23, inf }
  0xd0   :  { %163 = vmax.xlane.f32.xlu1 %v162_v21  ;;  %155 = vmax.xlane.f32.xlu0 %v154_v22 }
  0xd4   :  { %172 = vmin.xlane.f32.xlu1 %v171_v24 }
 0x159   :  { %v164_v28 = vpop.xlane.xlu1 %163  ;;  %v156_v29 = vpop.xlane.xlu0 %155 }
 0x15a   :  { %v165_v30 = vmax.f32 %v160_v26, %v164_v28  ;;  %v157_v31 = vmax.f32 %v149_v27, %v156_v29 }
 0x15c   :  { %166 = vst.msk [vmem:[#allocation3] sm:$0xff] %vm27_vm0, %v165_v30  ;;  %159 = vst.msk [vmem:[#allocation2] sm:$0xff] %vm27_vm0, %v157_v31 }
 0x15d   :  { %v173_v33 = vpop.xlane.xlu1 %172 }
 0x15e   :  { %v174_v34 = vmin.f32 %v167_v32, %v173_v33 }
 0x160   :  { %175 = vst.msk [vmem:[#allocation4] sm:$0xff] %vm27_vm0, %v174_v34 }
 0x163   :  { %v179_v35 = vld [vmem:[#allocation2] sm:$0xff]  ;;  %v188_v36 = vld [vmem:[#allocation3] sm:$0xff] }
 0x164   :  { %237 = vrsqrt.f32 %v179_v35  ;;  %vm182_vm12 = vcmp.eq.f32.partialorder %v179_v35, inf  ;;  %v185_v44 = vand.u32 2147483648, %v179_v35  ;;  %vm184_vm14 = vcmp.eq.f32.partialorder %v179_v35, 0.0 }
 0x167   :  { %v187_v37 = vld [vmem:[#allocation4] sm:$0xff] }
 0x168   :  { %v189_v38 = vmin.f32 %v187_v37, %v188_v36 }
 0x16a   :  { %239 = vrsqrt.f32 %v189_v38  ;;  %vm192_vm13 = vcmp.eq.f32.partialorder %v189_v38, inf  ;;  %v195_v45 = vand.u32 2147483648, %v189_v38  ;;  %vm194_vm15 = vcmp.eq.f32.partialorder %v189_v38, 0.0 }
 0x171   :  { %v238_v39 = vpop.eup %237 }
 0x172   :  { %v181_v40 = vmul.f32 %v238_v39, %v179_v35 }
 0x174   :  { %v183_v42 = vsel %vm182_vm12, %v179_v35, %v181_v40 }
 0x175   :  { %v186_v47 = vsel %vm184_vm14, %v185_v44, %v183_v42 }
 0x177   :  { %v240_v41 = vpop.eup %239 }
 0x178   :  { %v191_v43 = vmul.f32 %v240_v41, %v189_v38 }
 0x17a   :  { %v193_v46 = vsel %vm192_vm13, %v189_v38, %v191_v43 }
 0x17b   :  { %v196_v48 = vsel %vm194_vm15, %v195_v45, %v193_v46 }
 0x17c   :  { %v197_v49 = vsub.f32 %v186_v47, %v196_v48 }
 0x17e   :  { %v199_v50 = vand.u32 2147483647, %v197_v49  ;;  %v198_v61 = vmax.f32 %v197_v49, 0.0 }
 0x180   :  { %v200_v51 = vsub.f32 0.0, %v199_v50 }
 0x182   :  { %v201_v52 = vmul.f32 1.442695, %v200_v51 }
 0x184   :  { %241 = vpow2.f32 %v201_v52 }
 0x191   :  { %v242_v53 = vpop.eup %241 }
 0x192   :  { %v203_v54 = vadd.f32 1.0, %v242_v53  ;;  %v206_v55 = vmul.f32 -0.5, %v242_v53  ;;  %v209_v57 = vand.u32 2147483647, %v242_v53 }
 0x194   :  { %243 = vlog2.f32 %v203_v54  ;;  %v207_v56 = vadd.f32 1.0, %v206_v55  ;;  %vm210_vm1 = vcmp.lt.f32.partialorder %v209_v57, 0.0004427343 }
 0x196   :  { %v208_v60 = vmul.f32 %v242_v53, %v207_v56 }
 0x1a1   :  { %v244_v58 = vpop.eup %243 }
 0x1a2   :  { %v205_v59 = vmul.f32 0.6931472, %v244_v58 }
 0x1a4   :  { %v211_v62 = vsel %vm210_vm1, %v208_v60, %v205_v59 }
 0x1a5   :  { %v212_v63 = vadd.f32 %v211_v62, %v198_v61 }
 0x1a7   :  { %215 = vst.msk [vmem:[%s321_s6] sm:$0xff] %vm27_vm0, %v212_v63 }

</bundles_post_ra>
